<compile_context>
chip_gen: v6e
topology: v6e:2x2x1
jax: 0.10.0
libtpu: 0.0.40
codegen_flags: <defaults>
</compile_context>

<pallas_src>
import jax
import jax.numpy as jnp
from jax.experimental import pallas as pl
from jax.experimental.pallas import tpu as pltpu


def spread_gnn_kernel(x_ref, wr1_ref, bl1_ref, wr2_ref, bl2_ref,
                      wr3_ref, bl3_ref, wp_ref, bp_ref, out_ref):
    f32 = jnp.float32
    TG, N, F = x_ref.shape
    cdt = wr1_ref.dtype  # MXU input dtype (f32 or bf16); accumulation is always f32

    def sage_relu(h, w_ref, b_ref):
        # Empty edge set -> mean aggregation == 0, so lin_l contributes only its
        # bias:  out = lin_r(h) + bias_l ; then ReLU (bias/ReLU in f32 on the VPU).
        acc = jnp.dot(h.astype(cdt), w_ref[...], preferred_element_type=f32)
        return jnp.maximum(acc + b_ref[...], 0.0)

    h = x_ref[...].reshape(TG * N, F)                 # (TG*N, 5)   f32
    h = sage_relu(h, wr1_ref, bl1_ref)                # (TG*N, 64)  f32
    h = sage_relu(h, wr2_ref, bl2_ref)                # (TG*N, 128) f32
    h = sage_relu(h, wr3_ref, bl3_ref)                # (TG*N, 128) f32

    # global_mean_pool: per-graph mean over the N nodes of each graph in this
    # tile (in-kernel reduction; no pooling matmul / (B, BN) operand).
    pooled = jnp.sum(h.reshape(TG, N, -1), axis=1) * (1.0 / N)   # (TG, 128) f32

    # Policy head; output block is lane-dense (last dim padded to 128k).
    out = jnp.dot(pooled.astype(cdt), wp_ref[...], preferred_element_type=f32)
    out_ref[...] = out + bp_ref[...]


def _pick_graph_tile(B, N, target_rows=512):
    """Whole-graph tile: TG graphs/step, ~target_rows node rows, TG | B, and
    TG == B or TG % 8 == 0 (so the (TG, OUT_PAD) output block is tileable)."""
    cand = max(1, min(B, target_rows // max(N, 1)))
    for tg in range(cand, 0, -1):
        if B % tg == 0 and (tg == B or tg % 8 == 0):
            return tg
    return B


def spread_gnn_forward(obs, params, num_units, compute_dtype=jnp.float32):
    """obs: (B, num_units*5) -> policy logits (B, num_outputs)."""
    f32 = jnp.float32
    B = obs.shape[0]
    N = num_units
    num_outputs = params["wp"].shape[1]
    out_pad = 128 * pl.cdiv(num_outputs, 128)

    # Node features, grouped per graph: (B, N, 5), f32 (tiny; cast to compute
    # dtype happens next to the matmuls inside the kernel).
    x3 = obs.astype(f32).reshape(B, N, 5)

    cdt = compute_dtype
    wr1 = params["wr1"].astype(cdt)
    wr2 = params["wr2"].astype(cdt)
    wr3 = params["wr3"].astype(cdt)
    wp = jnp.pad(params["wp"], ((0, 0), (0, out_pad - num_outputs))).astype(cdt)
    bl1 = params["bl1"].astype(f32)
    bl2 = params["bl2"].astype(f32)
    bl3 = params["bl3"].astype(f32)
    bp = jnp.pad(params["bp"], ((0, 0), (0, out_pad - num_outputs))).astype(f32)

    TG = _pick_graph_tile(B, N)
    grid = (B // TG,)

    def resident(arr):
        shape = arr.shape
        return pl.BlockSpec(shape, lambda i, _s=shape: tuple(0 for _ in _s))

    in_specs = [
        pl.BlockSpec((TG, N, 5), lambda i: (i, 0, 0)),   # node-feature tile stream
        resident(wr1), resident(bl1),
        resident(wr2), resident(bl2),
        resident(wr3), resident(bl3),
        resident(wp), resident(bp),
    ]
    out_specs = pl.BlockSpec((TG, out_pad), lambda i: (i, 0))

    out = pl.pallas_call(
        spread_gnn_kernel,
        out_shape=jax.ShapeDtypeStruct((B, out_pad), f32),
        grid=grid,
        in_specs=in_specs,
        out_specs=out_specs,
        compiler_params=pltpu.CompilerParams(
            dimension_semantics=("parallel",)),   # 2nd TC on v7x; no-op on v5e/v6e
    )(x3, wr1, bl1, wr2, bl2, wr3, bl3, wp, bp)

    return out[:, :num_outputs]


def reference_forward(obs, params, num_units, compute_dtype=jnp.float32):
    """Pure-JAX reference mirroring the kernel's precision (matmul inputs in
    compute_dtype, f32 accumulation).  Math is identical to the original module:
    the zero aggregation contributes only lin_l's bias."""
    f32 = jnp.float32
    cdt = compute_dtype
    B = obs.shape[0]
    N = num_units
    x = obs.astype(f32).reshape(B * N, 5)

    def sage_relu(h, w, b):
        acc = jnp.dot(h.astype(cdt), w.astype(cdt), preferred_element_type=f32)
        return jnp.maximum(acc + b, 0.0)

    h = sage_relu(x, params["wr1"], params["bl1"])
    h = sage_relu(h, params["wr2"], params["bl2"])
    h = sage_relu(h, params["wr3"], params["bl3"])
    pooled = h.reshape(B, N, -1).mean(axis=1)
    out = jnp.dot(pooled.astype(cdt), params["wp"].astype(cdt),
                  preferred_element_type=f32)
    return out + params["bp"]


def init_params(key, num_outputs):
    """Deterministic synthetic weights (Kaiming-uniform-like, like nn.Linear)."""
    def lin(k, fan_in, fan_out):
        kw, kb = jax.random.split(k)
        bound = 1.0 / (fan_in ** 0.5)
        w = jax.random.uniform(kw, (fan_in, fan_out), jnp.float32, -bound, bound)
        b = jax.random.uniform(kb, (1, fan_out), jnp.float32, -bound, bound)
        return w, b

    ks = jax.random.split(key, 7)
    wl1, bl1 = lin(ks[0], 5, 64)      # lin_l weight (wl*) is dead: it multiplies the
    wr1, _ = lin(ks[1], 5, 64)        # all-zero aggregation; only its bias survives.
    wl2, bl2 = lin(ks[2], 64, 128)
    wr2, _ = lin(ks[3], 64, 128)
    wl3, bl3 = lin(ks[4], 128, 128)
    wr3, _ = lin(ks[5], 128, 128)
    wp, bp = lin(ks[6], 128, num_outputs)
    return dict(wl1=wl1, wr1=wr1, bl1=bl1,
                wl2=wl2, wr2=wr2, bl2=bl2,
                wl3=wl3, wr3=wr3, bl3=bl3,
                wp=wp, bp=bp)


if __name__ == "__main__":
    num_units = 4          # obs dim = num_units * 5 = 20
    num_outputs = 5
    batch = 2

    key = jax.random.PRNGKey(0)
    kp, kx = jax.random.split(key)
    params = init_params(kp, num_outputs)
    obs = jax.random.normal(kx, (batch, num_units * 5), jnp.float32)

    # Exact f32 path.
    out = jax.block_until_ready(
        spread_gnn_forward(obs, params, num_units, jnp.float32))
    ref = reference_forward(obs, params, num_units, jnp.float32)
    assert out.shape == (batch, num_outputs)
    assert jnp.allclose(out, ref, atol=1e-4, rtol=1e-4), (out, ref)

    # bf16-MXU path with f32 accumulation (bandwidth / throughput on v6e/v7x).
    out_bf = jax.block_until_ready(
        spread_gnn_forward(obs, params, num_units, jnp.bfloat16))
    ref_bf = reference_forward(obs, params, num_units, jnp.bfloat16)
    assert jnp.allclose(out_bf, ref_bf, atol=2e-3, rtol=2e-3), (out_bf, ref_bf)
    assert jnp.allclose(out_bf, ref, atol=5e-2, rtol=5e-2), (out_bf, ref)

    print("KERNEL_OK")
</pallas_src>

<mosaic_0001>
module attributes {stable_mosaic.version = 11 : i64} {
  func.func @spread_gnn_kernel(%arg0: i32, %arg1: memref<2x4x5xf32, #tpu.memory_space<vmem>>, %arg2: memref<5x64xf32, #tpu.memory_space<vmem>>, %arg3: memref<1x64xf32, #tpu.memory_space<vmem>>, %arg4: memref<64x128xf32, #tpu.memory_space<vmem>>, %arg5: memref<1x128xf32, #tpu.memory_space<vmem>>, %arg6: memref<128x128xf32, #tpu.memory_space<vmem>>, %arg7: memref<1x128xf32, #tpu.memory_space<vmem>>, %arg8: memref<128x128xf32, #tpu.memory_space<vmem>>, %arg9: memref<1x128xf32, #tpu.memory_space<vmem>>, %arg10: memref<2x128xf32, #tpu.memory_space<vmem>>) attributes {dimension_semantics = [#tpu.dimension_semantics<parallel>], iteration_bounds = array<i64: 1>, scalar_prefetch = 0 : i64, scratch_operands = 0 : i64, tpu.core_type = #tpu.core_type<tc>, window_params = [{transform_indices = @transform_0, window_bounds = array<i64: 2, 4, 5>}, {pipeline_mode = #tpu.pipeline_mode<synchronous>, transform_indices = @transform_1, window_bounds = array<i64: 5, 64>}, {pipeline_mode = #tpu.pipeline_mode<synchronous>, transform_indices = @transform_2, window_bounds = array<i64: 1, 64>}, {pipeline_mode = #tpu.pipeline_mode<synchronous>, transform_indices = @transform_3, window_bounds = array<i64: 64, 128>}, {pipeline_mode = #tpu.pipeline_mode<synchronous>, transform_indices = @transform_4, window_bounds = array<i64: 1, 128>}, {pipeline_mode = #tpu.pipeline_mode<synchronous>, transform_indices = @transform_5, window_bounds = array<i64: 128, 128>}, {pipeline_mode = #tpu.pipeline_mode<synchronous>, transform_indices = @transform_6, window_bounds = array<i64: 1, 128>}, {pipeline_mode = #tpu.pipeline_mode<synchronous>, transform_indices = @transform_7, window_bounds = array<i64: 128, 128>}, {pipeline_mode = #tpu.pipeline_mode<synchronous>, transform_indices = @transform_8, window_bounds = array<i64: 1, 128>}, {transform_indices = @transform_9, window_bounds = array<i64: 2, 128>}]} {
    %c0 = arith.constant 0 : index
    %c0_0 = arith.constant 0 : index
    %c0_1 = arith.constant 0 : index
    %0 = vector.load %arg1[%c0, %c0_0, %c0_1] : memref<2x4x5xf32, #tpu.memory_space<vmem>>, vector<2x4x5xf32>
    %1 = vector.shape_cast %0 : vector<2x4x5xf32> to vector<8x5xf32>
    %c0_2 = arith.constant 0 : index
    %c0_3 = arith.constant 0 : index
    %2 = vector.load %arg2[%c0_2, %c0_3] : memref<5x64xf32, #tpu.memory_space<vmem>>, vector<5x64xf32>
    %cst = arith.constant dense<0.000000e+00> : vector<8x64xf32>
    %3 = tpu.matmul %1, %2, %cst {dimension_numbers = #tpu.dot_dimension_numbers<[1], [0], [0], [1], [0, 0, 1, 1], [], []>} : vector<8x5xf32>, vector<5x64xf32>, vector<8x64xf32> -> vector<8x64xf32>
    %c0_4 = arith.constant 0 : index
    %c0_5 = arith.constant 0 : index
    %4 = vector.load %arg3[%c0_4, %c0_5] : memref<1x64xf32, #tpu.memory_space<vmem>>, vector<1x64xf32>
    %5 = vector.broadcast %4 : vector<1x64xf32> to vector<8x64xf32>
    %6 = arith.addf %3, %5 : vector<8x64xf32>
    %cst_6 = arith.constant 0.000000e+00 : f32
    %7 = vector.broadcast %cst_6 : f32 to vector<8x64xf32>
    %8 = arith.maximumf %6, %7 : vector<8x64xf32>
    %c0_7 = arith.constant 0 : index
    %c0_8 = arith.constant 0 : index
    %9 = vector.load %arg4[%c0_7, %c0_8] : memref<64x128xf32, #tpu.memory_space<vmem>>, vector<64x128xf32>
    %cst_9 = arith.constant dense<0.000000e+00> : vector<8x128xf32>
    %10 = tpu.matmul %8, %9, %cst_9 {dimension_numbers = #tpu.dot_dimension_numbers<[1], [0], [0], [1], [0, 0, 1, 1], [], []>} : vector<8x64xf32>, vector<64x128xf32>, vector<8x128xf32> -> vector<8x128xf32>
    %c0_10 = arith.constant 0 : index
    %c0_11 = arith.constant 0 : index
    %11 = vector.load %arg5[%c0_10, %c0_11] : memref<1x128xf32, #tpu.memory_space<vmem>>, vector<1x128xf32>
    %12 = vector.broadcast %11 : vector<1x128xf32> to vector<8x128xf32>
    %13 = arith.addf %10, %12 : vector<8x128xf32>
    %cst_12 = arith.constant 0.000000e+00 : f32
    %14 = vector.broadcast %cst_12 : f32 to vector<8x128xf32>
    %15 = arith.maximumf %13, %14 : vector<8x128xf32>
    %c0_13 = arith.constant 0 : index
    %c0_14 = arith.constant 0 : index
    %16 = vector.load %arg6[%c0_13, %c0_14] : memref<128x128xf32, #tpu.memory_space<vmem>>, vector<128x128xf32>
    %cst_15 = arith.constant dense<0.000000e+00> : vector<8x128xf32>
    %17 = tpu.matmul %15, %16, %cst_15 {dimension_numbers = #tpu.dot_dimension_numbers<[1], [0], [0], [1], [0, 0, 1, 1], [], []>} : vector<8x128xf32>, vector<128x128xf32>, vector<8x128xf32> -> vector<8x128xf32>
    %c0_16 = arith.constant 0 : index
    %c0_17 = arith.constant 0 : index
    %18 = vector.load %arg7[%c0_16, %c0_17] : memref<1x128xf32, #tpu.memory_space<vmem>>, vector<1x128xf32>
    %19 = vector.broadcast %18 : vector<1x128xf32> to vector<8x128xf32>
    %20 = arith.addf %17, %19 : vector<8x128xf32>
    %cst_18 = arith.constant 0.000000e+00 : f32
    %21 = vector.broadcast %cst_18 : f32 to vector<8x128xf32>
    %22 = arith.maximumf %20, %21 : vector<8x128xf32>
    %23 = vector.shape_cast %22 : vector<8x128xf32> to vector<2x4x128xf32>
    %cst_19 = arith.constant dense<0.000000e+00> : vector<2x128xf32>
    %24 = vector.multi_reduction <add>, %23, %cst_19 [1] : vector<2x4x128xf32> to vector<2x128xf32>
    %cst_20 = arith.constant 2.500000e-01 : f32
    %25 = vector.broadcast %cst_20 : f32 to vector<2x128xf32>
    %26 = arith.mulf %24, %25 : vector<2x128xf32>
    %c0_21 = arith.constant 0 : index
    %c0_22 = arith.constant 0 : index
    %27 = vector.load %arg8[%c0_21, %c0_22] : memref<128x128xf32, #tpu.memory_space<vmem>>, vector<128x128xf32>
    %cst_23 = arith.constant dense<0.000000e+00> : vector<2x128xf32>
    %28 = tpu.matmul %26, %27, %cst_23 {dimension_numbers = #tpu.dot_dimension_numbers<[1], [0], [0], [1], [0, 0, 1, 1], [], []>} : vector<2x128xf32>, vector<128x128xf32>, vector<2x128xf32> -> vector<2x128xf32>
    %c0_24 = arith.constant 0 : index
    %c0_25 = arith.constant 0 : index
    %29 = vector.load %arg9[%c0_24, %c0_25] : memref<1x128xf32, #tpu.memory_space<vmem>>, vector<1x128xf32>
    %30 = vector.broadcast %29 : vector<1x128xf32> to vector<2x128xf32>
    %31 = arith.addf %28, %30 : vector<2x128xf32>
    %c0_26 = arith.constant 0 : index
    %c0_27 = arith.constant 0 : index
    %32 = vector.load %arg10[%c0_26, %c0_27] : memref<2x128xf32, #tpu.memory_space<vmem>>, vector<2x128xf32>
    tpu.vector_store %arg10[%c0_26, %c0_27], %31 {strides = array<i32>} : memref<2x128xf32, #tpu.memory_space<vmem>>, vector<2x128xf32>,
    return
  }
  func.func @transform_0(%arg0: i32) -> (i32, i32, i32) {
    %c0_i32 = arith.constant 0 : i32
    %c0_i32_0 = arith.constant 0 : i32
    %c0_i32_1 = arith.constant 0 : i32
    return %arg0, %c0_i32, %c0_i32_0 : i32, i32, i32
  }
  func.func @transform_1(%arg0: i32) -> (i32, i32) {
    %c0_i32 = arith.constant 0 : i32
    %c0_i32_0 = arith.constant 0 : i32
    %c0_i32_1 = arith.constant 0 : i32
    return %c0_i32, %c0_i32_0 : i32, i32
  }
  func.func @transform_2(%arg0: i32) -> (i32, i32) {
    %c0_i32 = arith.constant 0 : i32
    %c0_i32_0 = arith.constant 0 : i32
    %c0_i32_1 = arith.constant 0 : i32
    return %c0_i32, %c0_i32_0 : i32, i32
  }
  func.func @transform_3(%arg0: i32) -> (i32, i32) {
    %c0_i32 = arith.constant 0 : i32
    %c0_i32_0 = arith.constant 0 : i32
    %c0_i32_1 = arith.constant 0 : i32
    return %c0_i32, %c0_i32_0 : i32, i32
  }
  func.func @transform_4(%arg0: i32) -> (i32, i32) {
    %c0_i32 = arith.constant 0 : i32
    %c0_i32_0 = arith.constant 0 : i32
    %c0_i32_1 = arith.constant 0 : i32
    return %c0_i32, %c0_i32_0 : i32, i32
  }
  func.func @transform_5(%arg0: i32) -> (i32, i32) {
    %c0_i32 = arith.constant 0 : i32
    %c0_i32_0 = arith.constant 0 : i32
    %c0_i32_1 = arith.constant 0 : i32
    return %c0_i32, %c0_i32_0 : i32, i32
  }
  func.func @transform_6(%arg0: i32) -> (i32, i32) {
    %c0_i32 = arith.constant 0 : i32
    %c0_i32_0 = arith.constant 0 : i32
    %c0_i32_1 = arith.constant 0 : i32
    return %c0_i32, %c0_i32_0 : i32, i32
  }
  func.func @transform_7(%arg0: i32) -> (i32, i32) {
    %c0_i32 = arith.constant 0 : i32
    %c0_i32_0 = arith.constant 0 : i32
    %c0_i32_1 = arith.constant 0 : i32
    return %c0_i32, %c0_i32_0 : i32, i32
  }
  func.func @transform_8(%arg0: i32) -> (i32, i32) {
    %c0_i32 = arith.constant 0 : i32
    %c0_i32_0 = arith.constant 0 : i32
    %c0_i32_1 = arith.constant 0 : i32
    return %c0_i32, %c0_i32_0 : i32, i32
  }
  func.func @transform_9(%arg0: i32) -> (i32, i32) {
    %c0_i32 = arith.constant 0 : i32
    %c0_i32_0 = arith.constant 0 : i32
    return %arg0, %c0_i32 : i32, i32
  }
}

</mosaic_0001>

<bundles_post_ra>
// kernel: tpu_custom_call.1
= control target key start
LH: loop header
LB: loop body
LE: loop exit
PB: predicated region body
PF: predicated region fallthrough
CT: control target
= control target key end

     0   :  { %14 = vsyncpa [#allocation3], 0  ;;  %s947_s0 = inlined_call_operand.hbm [shape: f32[2,4,5], index: 0, kind: input, shape index: {}]   ;;  %s948_s1 = inlined_call_operand.hbm [shape: f32[5,64], index: 1, kind: input, shape index: {}]   ;;  %s949_s2 = inlined_call_operand.vmem [shape: f32[1,64], index: 2, kind: input, shape index: {}]   ;;  %s950_s3 = inlined_call_operand.hbm [shape: f32[64,128], index: 3, kind: input, shape index: {}]   ;;  %s951_s4 = inlined_call_operand.vmem [shape: f32[1,128], index: 4, kind: input, shape index: {}]   ;;  %s952_s5 = inlined_call_operand.hbm [shape: f32[128,128], index: 5, kind: input, shape index: {}]   ;;  %s953_s6 = inlined_call_operand.vmem [shape: f32[1,128], index: 6, kind: input, shape index: {}]   ;;  %s954_s7 = inlined_call_operand.hbm [shape: f32[128,128], index: 7, kind: input, shape index: {}]   ;;  %s955_s8 = inlined_call_operand.vmem [shape: f32[1,128], index: 8, kind: input, shape index: {}]   ;;  %s956_s9 = inlined_call_operand.hbm [shape: f32[2,128], index: 9, kind: output, shape index: {}]  }
   0x1   :  { %15 = vsyncpa [#allocation6], 0 }
   0x2   :  { %16 = vsyncpa [#allocation9], 0 }
   0x3   :  { %17 = vsyncpa [#allocation4], 0  ;;  %s797_s30 = smov [#allocation5]  }
   0x4   :  { %s36_s10 = sshll.u32 %s797_s30, 4  ;;  %s37_s10 = int_to_ptr.vmem [resolvable:$true] %s36_s10 }
   0x5   :  { %s677_s11 = scalar_lea.vmem %s37_s10, 128  ;;  %p682_p1 = scmp.lt.s32.totalorder %s37_s10, %s37_s10 }
   0x6   :  { %p678_p0 = scmp.ne.s32.totalorder %s37_s10, %s677_s11  ;;  %p683_p2 = scmp.lt.s32.totalorder %s677_s11, %s677_s11 }
   0x8   :  { %p684_p3 = por %p683_p2, %p682_p1 }
   0xa   :  { %p685_p4 = pnand %p684_p3, %p678_p0 }
   0xc   :  { %688 = shalt.err (!%p685_p4)
}
   0xd   :  { %39 = dma.hbm_to_vmem [thread:$0]  %s948_s1, 128, %s37_s10, [#allocation6]  }
   0xe   :  { %s798_s14 = smov [#allocation8]   ;;  %s799_s16 = smov [#allocation2]  }
   0xf   :  { %s61_s15 = sshll.u32 %s798_s14, 4  ;;  %s23_s17 = sshll.u32 %s799_s16, 4  ;;  %s62_s15 = int_to_ptr.vmem [resolvable:$true] %s61_s15  ;;  %s24_s17 = int_to_ptr.vmem [resolvable:$true] %s23_s17 }
  0x10   :  { %s697_s18 = scalar_lea.vmem %s62_s15, 2048  ;;  %p702_p6 = scmp.lt.s32.totalorder %s62_s15, %s62_s15 }
  0x11   :  { %p698_p5 = scmp.ne.s32.totalorder %s62_s15, %s697_s18  ;;  %p703_p7 = scmp.lt.s32.totalorder %s697_s18, %s697_s18 }
  0x13   :  { %p704_p8 = por %p703_p7, %p702_p6 }
  0x15   :  { %p705_p9 = pnand %p704_p8, %p698_p5 }
  0x17   :  { %708 = shalt.err (!%p705_p9)
}
  0x18   :  { %s800_s19 = smov 128   ;;  %s801_s20 = smov 8  }
  0x19   :  { %67 = dma.hbm_to_vmem [thread:$0]  %s952_s5, 2048, %s62_s15, [#allocation9], %s800_s19, %s800_s19, %s801_s20  }
  0x1a   :  { %s717_s1 = scalar_lea.vmem %s24_s17, 128  ;;  %p722_p11 = scmp.lt.s32.totalorder %s24_s17, %s24_s17 }
  0x1b   :  { %p718_p10 = scmp.ne.s32.totalorder %s24_s17, %s717_s1  ;;  %p723_p12 = scmp.lt.s32.totalorder %s717_s1, %s717_s1 }
  0x1d   :  { %p724_p13 = por %p723_p12, %p722_p11 }
  0x1f   :  { %p725_p0 = pnand %p724_p13, %p718_p10 }
  0x21   :  { %728 = shalt.err (!%p725_p0)
}
  0x22   :  { %s802_s23 = smov 64   ;;  %s803_s24 = smov 4  }
  0x23   :  { %29 = dma.hbm_to_vmem [thread:$0]  %s947_s0, 128, %s24_s17, [#allocation3], %s802_s23, %s802_s23, %s803_s24  }
  0x24   :  { %s804_s27 = smov [#allocation7]   ;;  %s805_s29 = smov [#allocation10]  }
  0x25   :  { %s47_s28 = sshll.u32 %s804_s27, 4  ;;  %s75_s30 = sshll.u32 %s805_s29, 4  ;;  %s48_s28 = int_to_ptr.vmem [resolvable:$true] %s47_s28  ;;  %s76_s30 = int_to_ptr.vmem [resolvable:$true] %s75_s30 }
  0x26   :  { %s737_s5 = scalar_lea.vmem %s48_s28, 1024  ;;  %p742_p2 = scmp.lt.s32.totalorder %s48_s28, %s48_s28 }
  0x27   :  { %p738_p1 = scmp.ne.s32.totalorder %s48_s28, %s737_s5  ;;  %p743_p3 = scmp.lt.s32.totalorder %s737_s5, %s737_s5 }
  0x29   :  { %p744_p4 = por %p743_p3, %p742_p2 }
  0x2b   :  { %p745_p5 = pnand %p744_p4, %p738_p1 }
  0x2d   :  { %748 = shalt.err (!%p745_p5)
}
  0x2e   :  { %53 = dma.hbm_to_vmem [thread:$0]  %s950_s3, 1024, %s48_s28, [#allocation6], %s800_s19, %s800_s19, %s801_s20  }
  0x2f   :  { %s757_s0 = scalar_lea.vmem %s76_s30, 2048  ;;  %p762_p7 = scmp.lt.s32.totalorder %s76_s30, %s76_s30 }
  0x30   :  { %p758_p6 = scmp.ne.s32.totalorder %s76_s30, %s757_s0  ;;  %p763_p8 = scmp.lt.s32.totalorder %s757_s0, %s757_s0 }
  0x32   :  { %p764_p9 = por %p763_p8, %p762_p7 }
  0x34   :  { %p765_p10 = pnand %p764_p9, %p758_p6 }
  0x36   :  { %768 = shalt.err (!%p765_p10)
}
  0x37   :  { %81 = dma.hbm_to_vmem [thread:$0]  %s954_s7, 2048, %s76_s30, [#allocation9], %s800_s19, %s800_s19, %s801_s20  }
  0x38   :  { %789 = dma.done.wait [#allocation3], 128  }
  0x39   :  { %790 = vsyncadd [#allocation3], 4294967168 }
  0x3a   :  { %791 = dma.done.wait [#allocation6], 1152  }
  0x3b   :  { %792 = vsyncadd [#allocation6], 4294966144 }
  0x3c   :  { %793 = dma.done.wait [#allocation9], 4096  }
  0x3d   :  { %794 = vsyncadd [#allocation9], 4294963200  ;;  %v806_v0 = vmov 0.0   ;;  %vm807_vm0 = vmmov 0   ;;  %vm115_vm1 = vcmask 1044480   ;;  %vm112_vm2 = vcmask 39936  }
  0x3e   :  { %562 = vmatprep.subr.mxu0 %v806_v0  ;;  %564 = vmatprep.mubr.msk.f32.mxu0 %vm807_vm0, %v806_v0  ;;  %v101_v1 = vld [vmem:[#allocation5] sm:$0x1f]  ;;  %v668_v2 = vld [vmem:[#allocation2] sm:$0xff]   ;;  %v195_v5 = vld [vmem:[#allocation7 + $0x28] sm:$0xff]  ;;  %vm205_vm3 = vcmask 523264   ;;  %vm377_vm4 = vcmask 1043456  }
  0x3f   :  { %567 = vmatprep.subr.mxu1 %v806_v0  ;;  %583 = vmatprep.mubr.msk.f32.mxu1 %vm807_vm0, %v806_v0  ;;  %v197_v3 = vld [vmem:[#allocation7 + $0x38] sm:$0xff]  ;;  %v196_v4 = vld [vmem:[#allocation7 + $0x30] sm:$0xff]  ;;  %v194_v6 = vld [vmem:[#allocation7 + $0x20] sm:$0xff]  ;;  %vm419_vm5 = vcmask 1041409   ;;  %s808_s17 = smov [#allocation11]  }
  0x40   :  { %563 = vmatpush3.msk.msra.mxu0 %vm115_vm1, %v101_v1  ;;  %568 = vmatpush3.msra.mxu1 %v197_v3  ;;  %v193_v7 = vld [vmem:[#allocation7 + $0x18] sm:$0xff]  ;;  %v192_v8 = vld [vmem:[#allocation7 + $0x10] sm:$0xff]  ;;  %v191_v9 = vld [vmem:[#allocation7 + $0x8] sm:$0xff]  ;;  %s499_s18 = sshll.u32 %s808_s17, 4  ;;  %s500_s18 = int_to_ptr.vmem [resolvable:$true] %s499_s18 }
  0x41   :  { %586 = vmatprep.subr.mxu0 %v806_v0  ;;  %565 = vmatmul.mubr.msk.f32.vlgmr.msra.gmra.mxu0 %vm112_vm2, %v668_v2  ;;  %v190_v10 = vld [vmem:[#allocation7] sm:$0xff]  ;;  %v295_v11 = vld [vmem:[#allocation8 + $0x78] sm:$0xff]  ;;  %v294_v12 = vld [vmem:[#allocation8 + $0x70] sm:$0xff]  ;;  %s769_s19 = scalar_lea.vmem %s500_s18, 32  ;;  %p774_p12 = scmp.lt.s32.totalorder %s500_s18, %s500_s18 }
  0x42   :  { %569 = vmatprep.subr.mxu1 %v806_v0  ;;  %618 = vmatprep.mubr.msk.f32.mxu0 %vm807_vm0, %v806_v0  ;;  %v293_v13 = vld [vmem:[#allocation8 + $0x68] sm:$0xff]  ;;  %v292_v14 = vld [vmem:[#allocation8 + $0x60] sm:$0xff]  ;;  %v291_v15 = vld [vmem:[#allocation8 + $0x58] sm:$0xff]  ;;  %p770_p11 = scmp.ne.s32.totalorder %s500_s18, %s769_s19  ;;  %p775_p13 = scmp.lt.s32.totalorder %s769_s19, %s769_s19 }
  0x43   :  { %570 = vmatpush3.msra.mxu1 %v196_v4  ;;  %587 = vmatpush3.msra.mxu0 %v295_v11  ;;  %v290_v16 = vld [vmem:[#allocation8 + $0x50] sm:$0xff]  ;;  %v289_v17 = vld [vmem:[#allocation8 + $0x48] sm:$0xff]  ;;  %v288_v18 = vld [vmem:[#allocation8 + $0x40] sm:$0xff] }
  0x44   :  { %571 = vmatprep.subr.mxu1 %v806_v0  ;;  %588 = vmatprep.subr.mxu0 %v806_v0  ;;  %v287_v19 = vld [vmem:[#allocation8 + $0x38] sm:$0xff]  ;;  %v286_v20 = vld [vmem:[#allocation8 + $0x30] sm:$0xff]  ;;  %v285_v21 = vld [vmem:[#allocation8 + $0x28] sm:$0xff]  ;;  %p776_p0 = por %p775_p13, %p774_p12 }
  0x45   :  { %572 = vmatpush3.msra.mxu1 %v195_v5  ;;  %589 = vmatpush3.msra.mxu0 %v294_v12  ;;  %v284_v22 = vld [vmem:[#allocation8 + $0x20] sm:$0xff]  ;;  %v283_v23 = vld [vmem:[#allocation8 + $0x18] sm:$0xff]  ;;  %v510_v24 = vld [vmem:[%s949_s2] ss:$0 sm:$0xff] }
  0x46   :  { %573 = vmatprep.subr.mxu1 %v806_v0  ;;  %590 = vmatprep.subr.mxu0 %v806_v0  ;;  %v282_v29 = vld [vmem:[#allocation8 + $0x10] sm:$0xff]  ;;  %v281_v30 = vld [vmem:[#allocation8 + $0x8] sm:$0xff]  ;;  %v280_v31 = vld [vmem:[#allocation8] sm:$0xff]  ;;  %p777_p1 = pnand %p776_p0, %p770_p11 }
  0x47   :  { %574 = vmatpush3.msra.mxu1 %v194_v6  ;;  %591 = vmatpush3.msra.mxu0 %v293_v13  ;;  %v409_v32 = vld [vmem:[#allocation10 + $0x78] sm:$0xff]  ;;  %v408_v33 = vld [vmem:[#allocation10 + $0x70] sm:$0xff]  ;;  %v407_v34 = vld [vmem:[#allocation10 + $0x68] sm:$0xff] }
  0x48   :  { %575 = vmatprep.subr.mxu1 %v806_v0  ;;  %592 = vmatprep.subr.mxu0 %v806_v0  ;;  %v406_v35 = vld [vmem:[#allocation10 + $0x60] sm:$0xff]  ;;  %v513_v36 = vld [vmem:[%s951_s4] ss:$0 sm:$0xff]  ;;  %v405_v41 = vld [vmem:[#allocation10 + $0x58] sm:$0xff] }
  0x49   :  { %576 = vmatpush3.msra.mxu1 %v193_v7  ;;  %593 = vmatpush3.msra.mxu0 %v292_v14  ;;  %v404_v42 = vld [vmem:[#allocation10 + $0x50] sm:$0xff]  ;;  %v403_v43 = vld [vmem:[#allocation10 + $0x48] sm:$0xff]  ;;  %v402_v44 = vld [vmem:[#allocation10 + $0x40] sm:$0xff] }
  0x4a   :  { %577 = vmatprep.subr.mxu1 %v806_v0  ;;  %594 = vmatprep.subr.mxu0 %v806_v0  ;;  %v401_v45 = vld [vmem:[#allocation10 + $0x38] sm:$0xff]  ;;  %v400_v46 = vld [vmem:[#allocation10 + $0x30] sm:$0xff]  ;;  %v399_v47 = vld [vmem:[#allocation10 + $0x28] sm:$0xff] }
  0x4b   :  { %578 = vmatpush3.msra.mxu1 %v192_v8  ;;  %595 = vmatpush3.msra.mxu0 %v291_v15  ;;  %v398_v48 = vld [vmem:[#allocation10 + $0x20] sm:$0xff]  ;;  %v397_v49 = vld [vmem:[#allocation10 + $0x18] sm:$0xff]  ;;  %v396_v50 = vld [vmem:[#allocation10 + $0x10] sm:$0xff] }
  0x4c   :  { %579 = vmatprep.subr.mxu1 %v806_v0  ;;  %596 = vmatprep.subr.mxu0 %v806_v0  ;;  %v395_v51 = vld [vmem:[#allocation10 + $0x8] sm:$0xff]  ;;  %v394_v52 = vld [vmem:[#allocation10] sm:$0xff]  ;;  %v515_v53 = vld [vmem:[%s953_s6] ss:$0 sm:$0xff] }
  0x4d   :  { %580 = vmatpush3.msra.mxu1 %v191_v9  ;;  %597 = vmatpush3.msra.mxu0 %v290_v16  ;;  %v516_v12 = vld [vmem:[%s955_s8] ss:$0 sm:$0xff] }
  0x4e   :  { %581 = vmatprep.subr.mxu1 %v806_v0  ;;  %598 = vmatprep.subr.mxu0 %v806_v0 }
  0x4f   :  { %582 = vmatpush3.msra.mxu1 %v190_v10  ;;  %599 = vmatpush3.msra.mxu0 %v289_v17 }
  0x50   :  { %621 = vmatprep.subr.mxu1 %v806_v0  ;;  %600 = vmatprep.subr.mxu0 %v806_v0 }
  0x51   :  { %601 = vmatpush3.msra.mxu0 %v288_v18 }
  0x52   :  { %602 = vmatprep.subr.mxu0 %v806_v0 }
  0x53   :  { %603 = vmatpush3.msra.mxu0 %v287_v19 }
  0x54   :  { %604 = vmatprep.subr.mxu0 %v806_v0 }
  0x55   :  { %605 = vmatpush3.msra.mxu0 %v286_v20 }
  0x56   :  { %606 = vmatprep.subr.mxu0 %v806_v0 }
  0x57   :  { %607 = vmatpush3.msra.mxu0 %v285_v21 }
  0x58   :  { %608 = vmatprep.subr.mxu0 %v806_v0 }
  0x59   :  { %609 = vmatpush3.msra.mxu0 %v284_v22 }
  0x5a   :  { %610 = vmatprep.subr.mxu0 %v806_v0 }
  0x5b   :  { %611 = vmatpush3.msra.mxu0 %v283_v23 }
  0x5c   :  { %612 = vmatprep.subr.mxu0 %v806_v0 }
  0x5d   :  { %613 = vmatpush3.msra.mxu0 %v282_v29 }
  0x5e   :  { %614 = vmatprep.subr.mxu0 %v806_v0 }
  0x5f   :  { %615 = vmatpush3.msra.mxu0 %v281_v30 }
  0x60   :  { %616 = vmatprep.subr.mxu0 %v806_v0 }
  0x61   :  { %617 = vmatpush3.msra.mxu0 %v280_v31 }
 0x101   :  { %v185_v25 = vpop.f32.mrf.mxu0 }
 0x102   :  { %v186_v26 = vadd.f32 %v510_v24, %v185_v25 }
 0x103   :  { %v566_v27 = vpop.f32.mrf.mxu0 }
 0x104   :  { %v189_v28 = vmax.f32 %v186_v26, 0.0 }
 0x106   :  { %584 = vmatmul.mubr.msk.f32.vlgmr.msra.gmra.mxu1 %vm205_vm3, %v189_v28 }
 0x107   :  { %653 = vmatprep.mubr.msk.f32.mxu1 %vm807_vm0, %v806_v0  ;;  %622 = vmatpush3.msra.mxu1 %v409_v32 }
 0x108   :  { %623 = vmatprep.subr.mxu1 %v806_v0 }
 0x109   :  { %624 = vmatpush3.msra.mxu1 %v408_v33 }
 0x10a   :  { %625 = vmatprep.subr.mxu1 %v806_v0 }
 0x10b   :  { %626 = vmatpush3.msra.mxu1 %v407_v34 }
 0x10c   :  { %627 = vmatprep.subr.mxu1 %v806_v0 }
 0x10d   :  { %628 = vmatpush3.msra.mxu1 %v406_v35 }
 0x10e   :  { %629 = vmatprep.subr.mxu1 %v806_v0 }
 0x10f   :  { %630 = vmatpush3.msra.mxu1 %v405_v41 }
 0x110   :  { %631 = vmatprep.subr.mxu1 %v806_v0 }
 0x111   :  { %632 = vmatpush3.msra.mxu1 %v404_v42 }
 0x112   :  { %633 = vmatprep.subr.mxu1 %v806_v0 }
 0x113   :  { %634 = vmatpush3.msra.mxu1 %v403_v43 }
 0x114   :  { %635 = vmatprep.subr.mxu1 %v806_v0 }
 0x115   :  { %636 = vmatpush3.msra.mxu1 %v402_v44 }
 0x116   :  { %637 = vmatprep.subr.mxu1 %v806_v0 }
 0x117   :  { %638 = vmatpush3.msra.mxu1 %v401_v45 }
 0x118   :  { %639 = vmatprep.subr.mxu1 %v806_v0 }
 0x119   :  { %640 = vmatpush3.msra.mxu1 %v400_v46 }
 0x11a   :  { %641 = vmatprep.subr.mxu1 %v806_v0 }
 0x11b   :  { %642 = vmatpush3.msra.mxu1 %v399_v47 }
 0x11c   :  { %643 = vmatprep.subr.mxu1 %v806_v0 }
 0x11d   :  { %644 = vmatpush3.msra.mxu1 %v398_v48 }
 0x11e   :  { %645 = vmatprep.subr.mxu1 %v806_v0 }
 0x11f   :  { %646 = vmatpush3.msra.mxu1 %v397_v49 }
 0x120   :  { %647 = vmatprep.subr.mxu1 %v806_v0 }
 0x121   :  { %648 = vmatpush3.msra.mxu1 %v396_v50 }
 0x122   :  { %649 = vmatprep.subr.mxu1 %v806_v0 }
 0x123   :  { %650 = vmatpush3.msra.mxu1 %v395_v51 }
 0x124   :  { %651 = vmatprep.subr.mxu1 %v806_v0 }
 0x125   :  { %652 = vmatpush3.msra.mxu1 %v394_v52 }
 0x1c6   :  { %v275_v37 = vpop.f32.mrf.mxu1 }
 0x1c7   :  { %v276_v38 = vadd.f32 %v513_v36, %v275_v37 }
 0x1c8   :  { %v585_v39 = vpop.f32.mrf.mxu1 }
 0x1c9   :  { %v279_v40 = vmax.f32 %v276_v38, 0.0 }
 0x1cb   :  { %619 = vmatmul.mubr.f32.vlgmr.msra.gmra.mxu0 %v279_v40 }
 0x28b   :  { %v369_v54 = vpop.f32.mrf.mxu0 }
 0x28c   :  { %v370_v55 = vadd.f32 %v515_v53, %v369_v54 }
 0x28d   :  { %v620_v56 = vpop.f32.mrf.mxu0 }
 0x28e   :  { %v373_v57 = vmax.f32 %v370_v55, 0.0 }
 0x290   :  { %v375_v58 = vcombine.high %v373_v57, %v373_v57  ;;  %v378_v59 = vsel %vm377_vm4, %v373_v57, 0.0 }
 0x291   :  { %v379_v60 = vrot.slane %v378_v59, 4 }
 0x292   :  { %v385_v61 = vsel %vm377_vm4, %v375_v58, 0.0 }
 0x293   :  { %v380_v62 = vadd.f32 %v379_v60, %v378_v59  ;;  %v386_v63 = vrot.slane %v385_v61, 4 }
 0x295   :  { %v381_v1 = vrot.slane %v380_v62, 2  ;;  %v387_v2 = vadd.f32 %v386_v63, %v385_v61 }
 0x297   :  { %v382_v3 = vadd.f32 %v381_v1, %v380_v62  ;;  %v388_v0 = vrot.slane %v387_v2, 2 }
 0x299   :  { %v383_v4 = vrot.slane %v382_v3, 1  ;;  %v389_v5 = vadd.f32 %v388_v0, %v387_v2 }
 0x29b   :  { %v384_v6 = vadd.f32 %v383_v4, %v382_v3  ;;  %v390_v7 = vrot.slane %v389_v5, 1 }
 0x29d   :  { %v391_v8 = vadd.f32 %v390_v7, %v389_v5  ;;  %v392_v9 = vmul.f32 0.25, %v384_v6 }
 0x29f   :  { %v393_v10 = vmul.f32 0.25, %v391_v8 }
 0x2a1   :  { %v420_v11 = vsel %vm419_vm5, %v393_v10, %v392_v9 }
 0x2a2   :  { %654 = vmatmul.mubr.f32.vlgmr.msra.gmra.mxu1 %v420_v11 }
 0x362   :  { %v488_v13 = vpop.f32.mrf.mxu1 }
 0x363   :  { %v489_v14 = vadd.f32 %v516_v12, %v488_v13 }
 0x364   :  { %v655_v15 = vpop.f32.mrf.mxu1 }
 0x365   :  { %492 = vst [vmem:[#allocation11] sm:$0x3] %v489_v14 }
 0x366   :  { %780 = shalt.err (!%p777_p1)
}
 0x367   :  { %502 = dma.vmem_to_hbm [thread:$0]  %s500_s18, 32, %s956_s9, [#allocation4]  }
 0x368   :  { %795 = dma.done.wait [#allocation4], 32  }
 0x369   :  { %796 = vsyncadd [#allocation4], 4294967264 }
 0x36a   :  { %506 = vsyncpa [#allocation3], 1 }
 0x36b   :  { %507 = vsyncpa [#allocation6], 1 }
 0x36c   :  { %508 = vsyncpa [#allocation9], 1 }
 0x36d   :  { %509 = vsyncpa [#allocation4], 1 }

</bundles_post_ra>
